<compile_context>
chip_gen: v7x
topology: tpu7x:2x2x1
jax: 0.10.0
libtpu: 0.0.40
codegen_flags: <defaults>
</compile_context>

<pallas_src>
import math

import jax
import jax.numpy as jnp
from jax.experimental import pallas as pl
from jax.experimental.pallas import tpu as pltpu


def _round_up(x: int, m: int) -> int:
    return ((x + m - 1) // m) * m


def _pick_ff_tile(d_ff: int, tf_req: int) -> int:
    """Largest lane-aligned divisor of d_ff that is <= tf_req (else full d_ff)."""
    if d_ff <= tf_req:
        return d_ff
    # Prefer 256-aligned tiles (keeps the 256x256 MXU of v6e/v7x full), fall
    # back to 128-aligned (sufficient for v5e's 128x128 MXU).
    for align in (256, 128):
        best = 0
        cand = align
        while cand <= tf_req:
            if d_ff % cand == 0:
                best = cand
            cand += align
        if best:
            return best
    return d_ff  # no clean aligned divisor: keep d_ff resident (rare)


def _vmem_estimate(tm, tf, d_model, in_isz, w_isz, out_isz):
    """Rough VMEM footprint: double-buffered tiles + f32 acc + f32 hidden."""
    return (2 * tm * d_model * in_isz            # x row tile
            + 2 * tm * d_model * out_isz         # out row tile
            + 2 * d_model * tf * w_isz           # w1 chunk
            + 2 * tf * d_model * w_isz           # w2 chunk
            + 2 * tf * 4 + 2 * d_model * 4       # biases
            + tm * d_model * 4                   # f32 accumulator scratch
            + tm * tf * 4)                       # f32 hidden intermediate


def ffn_kernel(x_ref, w1_ref, b1_ref, w2_ref, b2_ref, o_ref, acc_ref):
    """Grid = (row_tiles, d_ff_tiles); d_ff is the innermost reduction axis."""
    k = pl.program_id(1)

    @pl.when(k == 0)
    def _init():
        # Fold the output bias into the accumulator init.
        acc_ref[...] = jnp.broadcast_to(b2_ref[...], acc_ref.shape)

    x = x_ref[...]                                          # (tm, d_model)
    h = jnp.dot(x, w1_ref[...],
                preferred_element_type=jnp.float32)         # (tm, tf) f32
    h = jnp.maximum(h + b1_ref[...], 0.0)                   # bias + ReLU in f32
    # Dropout: inference-mode identity.
    acc_ref[...] += jnp.dot(h.astype(w2_ref.dtype), w2_ref[...],
                            preferred_element_type=jnp.float32)

    @pl.when(k == pl.num_programs(1) - 1)
    def _finalize():
        o_ref[...] = acc_ref[...].astype(o_ref.dtype)


def feed_forward_block(x, w1, b1, w2, b2, *, tm=512, tf=2048,
                       compute_dtype=None, interpret=False):
    """x: (batch, seq, d_model). w1: (d_model, d_ff), w2: (d_ff, d_model).

    Returns (batch, seq, d_model) in x's original dtype.
    """
    batch, seq, d_model = x.shape
    d_ff = w1.shape[1]
    assert w1.shape == (d_model, d_ff)
    assert w2.shape == (d_ff, d_model)

    out_dtype = x.dtype
    if compute_dtype is not None:
        x = x.astype(compute_dtype)
        w1 = w1.astype(compute_dtype)
        w2 = w2.astype(compute_dtype)
    # Biases stay f32; they are added to the f32 accumulator / hidden.
    b1_2d = b1.reshape(1, d_ff).astype(jnp.float32)
    b2_2d = b2.reshape(1, d_model).astype(jnp.float32)

    M = batch * seq
    x2d = x.reshape(M, d_model)

    in_isz = jnp.dtype(x2d.dtype).itemsize
    w_isz = jnp.dtype(w1.dtype).itemsize
    out_isz = jnp.dtype(out_dtype).itemsize
    sublane = 8 * (4 // in_isz)              # 8 rows for f32, 16 for bf16

    tm_eff = min(_round_up(tm, sublane), _round_up(M, sublane))
    tf_eff = _pick_ff_tile(d_ff, tf)

    # Auto-shrink tiles to fit a conservative VMEM budget (v7x has 64 MiB/TC).
    budget = 48 * 2**20
    while (_vmem_estimate(tm_eff, tf_eff, d_model, in_isz, w_isz, out_isz) > budget
           and tf_eff > 128):
        new_tf = _pick_ff_tile(d_ff, tf_eff // 2)
        if new_tf >= tf_eff:
            break
        tf_eff = new_tf
    while (_vmem_estimate(tm_eff, tf_eff, d_model, in_isz, w_isz, out_isz) > budget
           and tm_eff > sublane):
        tm_eff = max(sublane, _round_up(tm_eff // 2, sublane))

    assert tm_eff % sublane == 0
    assert tf_eff == d_ff or tf_eff % 128 == 0
    assert d_ff % tf_eff == 0

    # Pad rows so no tail tile is dropped (cdiv + pad); sliced off afterwards.
    M_pad = _round_up(M, tm_eff)
    if M_pad != M:
        x2d = jnp.pad(x2d, ((0, M_pad - M), (0, 0)))

    grid = (M_pad // tm_eff, d_ff // tf_eff)
    grid_m, grid_k = grid

    vmem_bytes = _vmem_estimate(tm_eff, tf_eff, d_model, in_isz, w_isz, out_isz)
    vmem_limit = int(min(64 * 2**20, max(16 * 2**20, 2 * vmem_bytes)))

    weight_bytes = (w1.size + w2.size) * w_isz
    if grid_k > 1:
        weight_bytes *= grid_m                 # re-streamed per row tile
    cost = pl.CostEstimate(
        flops=4 * M_pad * d_model * d_ff,      # two matmuls
        transcendentals=0,
        bytes_accessed=(x2d.size * in_isz
                        + M_pad * d_model * out_isz
                        + weight_bytes
                        + (b1_2d.size + b2_2d.size) * 4),
    )

    out2d = pl.pallas_call(
        ffn_kernel,
        out_shape=jax.ShapeDtypeStruct((M_pad, d_model), out_dtype),
        grid_spec=pltpu.PrefetchScalarGridSpec(
            num_scalar_prefetch=0,
            grid=grid,
            in_specs=[
                pl.BlockSpec((tm_eff, d_model), lambda i, k: (i, 0)),   # x tile
                pl.BlockSpec((d_model, tf_eff), lambda i, k: (0, k)),   # w1 chunk
                pl.BlockSpec((1, tf_eff), lambda i, k: (0, k)),         # b1 chunk
                pl.BlockSpec((tf_eff, d_model), lambda i, k: (k, 0)),   # w2 chunk
                pl.BlockSpec((1, d_model), lambda i, k: (0, 0)),        # b2
            ],
            out_specs=pl.BlockSpec((tm_eff, d_model), lambda i, k: (i, 0)),
            scratch_shapes=[pltpu.VMEM((tm_eff, d_model), jnp.float32)],
        ),
        compiler_params=pltpu.CompilerParams(
            dimension_semantics=("parallel", "arbitrary"),
            vmem_limit_bytes=vmem_limit,
        ),
        cost_estimate=cost,
        interpret=interpret,
    )(x2d, w1, b1_2d, w2, b2_2d)

    if M_pad != M:
        out2d = out2d[:M]
    return out2d.reshape(batch, seq, d_model)


def init_params(key, d_model, d_ff, dtype=jnp.float32):
    """Deterministic init matching nn.Linear's U(-1/sqrt(fan_in), 1/sqrt(fan_in))."""
    k1, k2, k3, k4 = jax.random.split(key, 4)
    bound1 = 1.0 / math.sqrt(d_model)
    bound2 = 1.0 / math.sqrt(d_ff)
    # Stored already-transposed for the kernel: w1: (d_model, d_ff), w2: (d_ff, d_model)
    w1 = jax.random.uniform(k1, (d_model, d_ff), dtype, -bound1, bound1)
    b1 = jax.random.uniform(k2, (d_ff,), dtype, -bound1, bound1)
    w2 = jax.random.uniform(k3, (d_ff, d_model), dtype, -bound2, bound2)
    b2 = jax.random.uniform(k4, (d_model,), dtype, -bound2, bound2)
    return w1, b1, w2, b2


def reference(x, w1, b1, w2, b2):
    h = jnp.maximum(jnp.einsum("bsd,df->bsf", x, w1) + b1, 0.0)
    return jnp.einsum("bsf,fd->bsd", h, w2) + b2


if __name__ == "__main__":
    key = jax.random.PRNGKey(0)

    # --- 1) toy shapes consistent with the module (f32) ----------------------
    batch, seq, d_model, d_ff = 2, 8, 32, 64
    kx, kp = jax.random.split(key)
    x = jax.random.normal(kx, (batch, seq, d_model), dtype=jnp.float32)
    w1, b1, w2, b2 = init_params(kp, d_model, d_ff)

    out = jax.block_until_ready(feed_forward_block(x, w1, b1, w2, b2))
    ref = reference(x, w1, b1, w2, b2)
    assert out.shape == (batch, seq, d_model)
    assert jnp.allclose(out, ref, atol=1e-4, rtol=1e-4), "f32 mismatch vs reference"

    # --- 2) bf16 compute path (f32 accumulation, downcast on final store) ----
    out_bf = jax.block_until_ready(
        feed_forward_block(x, w1, b1, w2, b2, compute_dtype=jnp.bfloat16))
    assert out_bf.shape == (batch, seq, d_model)
    assert jnp.allclose(out_bf.astype(jnp.float32), ref, atol=1e-1, rtol=1e-1), \
        "bf16 mismatch vs reference"

    # --- 3) multi-tile grid: row tiling + padded tail + d_ff streaming -------
    b2_, s2_, dm2, df2 = 2, 250, 128, 512        # M=500 -> padded to 512
    kx2, kp2 = jax.random.split(jax.random.PRNGKey(0))
    x2 = jax.random.normal(kx2, (b2_, s2_, dm2), dtype=jnp.float32)
    params2 = init_params(kp2, dm2, df2)
    out2 = jax.block_until_ready(
        feed_forward_block(x2, *params2, tm=128, tf=128))
    ref2 = reference(x2, *params2)
    assert out2.shape == (b2_, s2_, dm2)
    assert jnp.allclose(out2, ref2, atol=2e-2, rtol=2e-2), "tiled mismatch vs reference"

    print("KERNEL_OK")
</pallas_src>

<mosaic_0001>
module attributes {stable_mosaic.version = 11 : i64} {
  func.func @ffn_kernel(%arg0: i32, %arg1: i32, %arg2: memref<16x32xf32, #tpu.memory_space<vmem>>, %arg3: memref<32x64xf32, #tpu.memory_space<vmem>>, %arg4: memref<1x64xf32, #tpu.memory_space<vmem>>, %arg5: memref<64x32xf32, #tpu.memory_space<vmem>>, %arg6: memref<1x32xf32, #tpu.memory_space<vmem>>, %arg7: memref<16x32xf32, #tpu.memory_space<vmem>>, %arg8: memref<16x32xf32, #tpu.memory_space<vmem>>) attributes {dimension_semantics = [#tpu.dimension_semantics<parallel>, #tpu.dimension_semantics<arbitrary>], iteration_bounds = array<i64: 1, 1>, scalar_prefetch = 0 : i64, scratch_operands = 1 : i64, tpu.core_type = #tpu.core_type<tc>, window_params = [{transform_indices = @transform_0, window_bounds = array<i64: 16, 32>}, {transform_indices = @transform_1, window_bounds = array<i64: 32, 64>}, {transform_indices = @transform_2, window_bounds = array<i64: 1, 64>}, {transform_indices = @transform_3, window_bounds = array<i64: 64, 32>}, {pipeline_mode = #tpu.pipeline_mode<synchronous>, transform_indices = @transform_4, window_bounds = array<i64: 1, 32>}, {transform_indices = @transform_5, window_bounds = array<i64: 16, 32>}]} {
    %c0_i32 = arith.constant 0 : i32
    %0 = arith.cmpi eq, %arg1, %c0_i32 : i32
    %1 = arith.extui %0 : i1 to i32
    %c0_i32_0 = arith.constant 0 : i32
    %2 = arith.cmpi ne, %1, %c0_i32_0 : i32
    scf.if %2 {
      %c0_16 = arith.constant 0 : index
      %c0_17 = arith.constant 0 : index
      %19 = vector.load %arg6[%c0_16, %c0_17] : memref<1x32xf32, #tpu.memory_space<vmem>>, vector<1x32xf32>
      %20 = vector.shape_cast %19 : vector<1x32xf32> to vector<1x32xf32>
      %21 = vector.broadcast %20 : vector<1x32xf32> to vector<16x32xf32>
      %c0_18 = arith.constant 0 : index
      %c0_19 = arith.constant 0 : index
      %22 = vector.load %arg8[%c0_18, %c0_19] : memref<16x32xf32, #tpu.memory_space<vmem>>, vector<16x32xf32>
      tpu.vector_store %arg8[%c0_18, %c0_19], %21 {strides = array<i32>} : memref<16x32xf32, #tpu.memory_space<vmem>>, vector<16x32xf32>,
    } else {
    }
    %c0 = arith.constant 0 : index
    %c0_1 = arith.constant 0 : index
    %3 = vector.load %arg2[%c0, %c0_1] : memref<16x32xf32, #tpu.memory_space<vmem>>, vector<16x32xf32>
    %c0_2 = arith.constant 0 : index
    %c0_3 = arith.constant 0 : index
    %4 = vector.load %arg3[%c0_2, %c0_3] : memref<32x64xf32, #tpu.memory_space<vmem>>, vector<32x64xf32>
    %cst = arith.constant dense<0.000000e+00> : vector<16x64xf32>
    %5 = tpu.matmul %3, %4, %cst {dimension_numbers = #tpu.dot_dimension_numbers<[1], [0], [0], [1], [0, 0, 1, 1], [], []>} : vector<16x32xf32>, vector<32x64xf32>, vector<16x64xf32> -> vector<16x64xf32>
    %c0_4 = arith.constant 0 : index
    %c0_5 = arith.constant 0 : index
    %6 = vector.load %arg4[%c0_4, %c0_5] : memref<1x64xf32, #tpu.memory_space<vmem>>, vector<1x64xf32>
    %7 = vector.broadcast %6 : vector<1x64xf32> to vector<16x64xf32>
    %8 = arith.addf %5, %7 : vector<16x64xf32>
    %cst_6 = arith.constant 0.000000e+00 : f32
    %9 = vector.broadcast %cst_6 : f32 to vector<16x64xf32>
    %10 = arith.maximumf %8, %9 : vector<16x64xf32>
    %c0_7 = arith.constant 0 : index
    %c0_8 = arith.constant 0 : index
    %11 = vector.load %arg8[%c0_7, %c0_8] : memref<16x32xf32, #tpu.memory_space<vmem>>, vector<16x32xf32>
    %c0_9 = arith.constant 0 : index
    %c0_10 = arith.constant 0 : index
    %12 = vector.load %arg5[%c0_9, %c0_10] : memref<64x32xf32, #tpu.memory_space<vmem>>, vector<64x32xf32>
    %cst_11 = arith.constant dense<0.000000e+00> : vector<16x32xf32>
    %13 = tpu.matmul %10, %12, %cst_11 {dimension_numbers = #tpu.dot_dimension_numbers<[1], [0], [0], [1], [0, 0, 1, 1], [], []>} : vector<16x64xf32>, vector<64x32xf32>, vector<16x32xf32> -> vector<16x32xf32>
    %14 = arith.addf %11, %13 : vector<16x32xf32>
    %c0_12 = arith.constant 0 : index
    %c0_13 = arith.constant 0 : index
    %15 = vector.load %arg8[%c0_12, %c0_13] : memref<16x32xf32, #tpu.memory_space<vmem>>, vector<16x32xf32>
    tpu.vector_store %arg8[%c0_12, %c0_13], %14 {strides = array<i32>} : memref<16x32xf32, #tpu.memory_space<vmem>>, vector<16x32xf32>,
    %c0_i32_14 = arith.constant 0 : i32
    %16 = arith.cmpi eq, %arg1, %c0_i32_14 : i32
    %17 = arith.extui %16 : i1 to i32
    %c0_i32_15 = arith.constant 0 : i32
    %18 = arith.cmpi ne, %17, %c0_i32_15 : i32
    scf.if %18 {
      %c0_16 = arith.constant 0 : index
      %c0_17 = arith.constant 0 : index
      %19 = vector.load %arg8[%c0_16, %c0_17] : memref<16x32xf32, #tpu.memory_space<vmem>>, vector<16x32xf32>
      %c0_18 = arith.constant 0 : index
      %c0_19 = arith.constant 0 : index
      %20 = vector.load %arg7[%c0_18, %c0_19] : memref<16x32xf32, #tpu.memory_space<vmem>>, vector<16x32xf32>
      tpu.vector_store %arg7[%c0_18, %c0_19], %19 {strides = array<i32>} : memref<16x32xf32, #tpu.memory_space<vmem>>, vector<16x32xf32>,
    } else {
    }
    return
  }
  func.func @transform_0(%arg0: i32, %arg1: i32) -> (i32, i32) {
    %c0_i32 = arith.constant 0 : i32
    %c0_i32_0 = arith.constant 0 : i32
    return %arg0, %c0_i32 : i32, i32
  }
  func.func @transform_1(%arg0: i32, %arg1: i32) -> (i32, i32) {
    %c0_i32 = arith.constant 0 : i32
    %c0_i32_0 = arith.constant 0 : i32
    return %c0_i32, %arg1 : i32, i32
  }
  func.func @transform_2(%arg0: i32, %arg1: i32) -> (i32, i32) {
    %c0_i32 = arith.constant 0 : i32
    %c0_i32_0 = arith.constant 0 : i32
    return %c0_i32, %arg1 : i32, i32
  }
  func.func @transform_3(%arg0: i32, %arg1: i32) -> (i32, i32) {
    %c0_i32 = arith.constant 0 : i32
    %c0_i32_0 = arith.constant 0 : i32
    return %arg1, %c0_i32 : i32, i32
  }
  func.func @transform_4(%arg0: i32, %arg1: i32) -> (i32, i32) {
    %c0_i32 = arith.constant 0 : i32
    %c0_i32_0 = arith.constant 0 : i32
    %c0_i32_1 = arith.constant 0 : i32
    return %c0_i32, %c0_i32_0 : i32, i32
  }
  func.func @transform_5(%arg0: i32, %arg1: i32) -> (i32, i32) {
    %c0_i32 = arith.constant 0 : i32
    %c0_i32_0 = arith.constant 0 : i32
    return %arg0, %c0_i32 : i32, i32
  }
}

</mosaic_0001>

<bundles_post_ra>
// kernel: tpu_custom_call.1
= control target key start
LH: loop header
LB: loop body
LE: loop exit
PB: predicated region body
PF: predicated region fallthrough
CT: control target
= control target key end

     0   :  { %vm32_vm0 = vcmask 261120   ;;  %s455_s0 = inlined_call_operand.vmem [shape: f32[16,32], index: 0, kind: input, shape index: {}]   ;;  %s456_s1 = inlined_call_operand.vmem [shape: f32[32,64], index: 1, kind: input, shape index: {}]   ;;  %s457_s2 = inlined_call_operand.vmem [shape: f32[1,64], index: 2, kind: input, shape index: {}]   ;;  %s458_s3 = inlined_call_operand.vmem [shape: f32[64,32], index: 3, kind: input, shape index: {}]   ;;  %s459_s4 = inlined_call_operand.vmem [shape: f32[1,32], index: 4, kind: input, shape index: {}]   ;;  %s460_s5 = inlined_call_operand.hbm [shape: f32[16,32], index: 5, kind: output, shape index: {}]  }
   0x1   :  { %v37_v0 = vld [vmem:[%s456_s1] sm:$0xff]  ;;  %v38_v1 = vld [vmem:[%s456_s1 + $0x8] sm:$0xff]  ;;  %v39_v2 = vld [vmem:[%s456_s1 + $0x10] sm:$0xff] }
   0x2   :  { %v303_v3 = vpack.c.bf16 %v38_v1, %v37_v0  ;;  %v40_v4 = vld [vmem:[%s456_s1 + $0x18] sm:$0xff]  ;;  %v35_v5 = vld [vmem:[%s455_s0] sm:$0xff]  ;;  %v135_v8 = vld [vmem:[%s458_s3 + $0x8] sm:$0xff] }
   0x3   :  { %v307_v6 = vpack.c.bf16 %v40_v4, %v39_v2  ;;  %281 = vmatprep.mubr.msk.f32.mxu0 %vm32_vm0, %v35_v5  ;;  %v134_v7 = vld [vmem:[%s458_s3] sm:$0xff]  ;;  %v136_v9 = vld [vmem:[%s458_s3 + $0x10] sm:$0xff]  ;;  %v137_v11 = vld [vmem:[%s458_s3 + $0x18] sm:$0xff] }
   0x4   :  { %304 = vmatprep.subr.bf16.mxu0 %v303_v3  ;;  %v311_v10 = vpack.c.bf16 %v135_v8, %v134_v7  ;;  %v315_v12 = vpack.c.bf16 %v137_v11, %v136_v9  ;;  %v138_v13 = vld [vmem:[%s458_s3 + $0x20] sm:$0xff]  ;;  %v139_v14 = vld [vmem:[%s458_s3 + $0x28] sm:$0xff] }
   0x5   :  { %306 = vmatpush3.bf16.msra.mxu0 %v303_v3 }
   0x6   :  { %10 = vsyncpa [#allocation4], 0  ;;  %308 = vmatprep.subr.bf16.mxu0 %v307_v6  ;;  %312 = vmatprep.subr.bf16.mxu1 %v311_v10  ;;  %v319_v15 = vpack.c.bf16 %v139_v14, %v138_v13  ;;  %v36_v16 = vld [vmem:[%s455_s0 + $0x8] sm:$0xff]  ;;  %v140_v17 = vld [vmem:[%s458_s3 + $0x30] sm:$0xff]  ;;  %vm142_vm1 = vcmask 523264  }
   0x7   :  { %314 = vmatpush3.bf16.msra.mxu1 %v311_v10  ;;  %v141_v18 = vld [vmem:[%s458_s3 + $0x38] sm:$0xff]  ;;  %v251_v20 = vld [vmem:[%s459_s4] ss:$0 sm:$0xff] }
   0x8   :  { %316 = vmatprep.subr.bf16.mxu1 %v315_v12  ;;  %v323_v19 = vpack.c.bf16 %v141_v18, %v140_v17  ;;  %34 = vst.msk [vmem:[#allocation2 + $0x8] sm:$0xff] %vm32_vm0, %v251_v20  ;;  %33 = vst.msk [vmem:[#allocation2] sm:$0xff] %vm32_vm0, %v251_v20  ;;  %v252_v21 = vld [vmem:[%s457_s2] ss:$0 sm:$0xff]  ;;  %s354_s2 = smov [#allocation3]  }
   0x9   :  { %310 = vmatpush3.bf16.msra.mxu0 %v307_v6  ;;  %s240_s3 = sshll.u32 %s354_s2, 4  ;;  %s241_s3 = int_to_ptr.vmem [resolvable:$true] %s240_s3 }
   0xa   :  { %s330_s4 = scalar_lea.vmem %s241_s3, 256  ;;  %p335_p1 = scmp.lt.s32.totalorder %s241_s3, %s241_s3 }
   0xb   :  { %318 = vmatpush3.bf16.msra.mxu1 %v315_v12  ;;  %p331_p0 = scmp.ne.s32.totalorder %s241_s3, %s330_s4  ;;  %p336_p2 = scmp.lt.s32.totalorder %s330_s4, %s330_s4 }
   0xc   :  { %282 = vmatmul.mubr.msk.f32.vlgmr.msra.gmra.mrb[0].mxu0 %vm32_vm0, %v36_v16  ;;  %320 = vmatprep.subr.bf16.mxu1 %v319_v15 }
   0xd   :  { %p337_p3 = por %p336_p2, %p335_p1 }
   0xf   :  { %322 = vmatpush3.bf16.msra.mxu1 %v319_v15  ;;  %v133_v28 = vld [vmem:[#allocation2 + $0x8] sm:$0xff]  ;;  %v132_v29 = vld [vmem:[#allocation2] sm:$0xff]  ;;  %p338_p4 = pnand %p337_p3, %p331_p0 }
  0x10   :  { %324 = vmatprep.subr.bf16.mxu1 %v323_v19 }
  0x13   :  { %326 = vmatpush3.bf16.msra.mxu1 %v323_v19 }
  0xdf   :  { %v283_v22 = vpop.f32.mrb[0].mxu0 }
  0xe0   :  { %v127_v23 = vadd.f32 %v283_v22, %v252_v21  ;;  %v121_v24 = vpop.f32.mrb[1].mxu0 }
  0xe1   :  { %v122_v25 = vadd.f32 %v252_v21, %v121_v24 }
  0xe2   :  { %v131_v27 = vmax.f32 %v127_v23, 0.0 }
  0xe3   :  { %v130_v26 = vmax.f32 %v122_v25, 0.0 }
  0xe5   :  { %300 = vmatprep.mubr.msk.f32.mxu1 %vm142_vm1, %v130_v26 }
  0xe6   :  { %301 = vmatmul.mubr.msk.f32.vlgmr.msra.gmra.mrb[0].mxu1 %vm142_vm1, %v131_v27 }
 0x1b9   :  { %v302_v30 = vpop.f32.mrb[0].mxu1 }
 0x1ba   :  { %v225_v31 = vadd.f32 %v302_v30, %v133_v28  ;;  %v215_v32 = vpop.f32.mrb[1].mxu1 }
 0x1bb   :  { %v224_v33 = vadd.f32 %v215_v32, %v132_v29 }
 0x1bc   :  { %227 = vst.msk [vmem:[#allocation2 + $0x8] sm:$0xff] %vm32_vm0, %v225_v31 }
 0x1bd   :  { %226 = vst.msk [vmem:[#allocation2] sm:$0xff] %vm32_vm0, %v224_v33 }
 0x1c3   :  { %v232_v34 = vld [vmem:[#allocation2 + $0x8] sm:$0xff] }
 0x1c4   :  { %v231_v35 = vld [vmem:[#allocation2] sm:$0xff]  ;;  %234 = vst.msk [vmem:[#allocation3 + $0x8] sm:$0xff] %vm32_vm0, %v232_v34 }
 0x1c5   :  { %233 = vst.msk [vmem:[#allocation3] sm:$0xff] %vm32_vm0, %v231_v35 }
 0x1c6   :  { %341 = shalt.err (!%p338_p4)
}
 0x1c7   :  { %s342_s25 = scalar_lea.hbm %s460_s5, 256 }
 0x1c8   :  { %p343_p5 = scmp.ne.s32.totalorder %s460_s5, %s342_s25  ;;  %p346_p6 = scmp.lt.u32.totalorder %s342_s25, %s460_s5 }
 0x1ca   :  { %p348_p7 = pnand %p346_p6, %p343_p5 }
 0x1cc   :  { %351 = shalt.err (!%p348_p7)
}
 0x1cd   :  { %s355_s30 = smov 128   ;;  %s356_s6 = smov 8  }
 0x1ce   :  { %246 = dma.vmem_to_hbm [thread:$0]  %s241_s3, 256, %s460_s5, [#allocation4], %s355_s30, %s355_s30, %s356_s6  }
 0x1cf   :  { %352 = dma.done.wait [#allocation4], 256  }
 0x1d0   :  { %353 = vsyncadd [#allocation4], 4294967040 }
 0x1d1   :  { %250 = vsyncpa [#allocation4], 1 }

</bundles_post_ra>
